<compile_context>
chip_gen: v7x
topology: tpu7x:2x2x1
jax: 0.10.0
libtpu: 0.0.40
codegen_flags: <defaults>
</compile_context>

<pallas_src>
import jax
import jax.numpy as jnp
from jax.experimental import pallas as pl
from jax.experimental.pallas import tpu as pltpu


def _round_up(x, m):
    return ((x + m - 1) // m) * m


def transition_mlp_kernel(x_ref, w1_ref, b1_ref, w2_ref, b2_ref, w3_ref, b3_ref, o_ref):
    # Cast activations to bf16 in-kernel (full-rate MXU inputs, f32 accumulate).
    x = x_ref[...].astype(jnp.bfloat16)
    # fc1 + ReLU (bias/ReLU in f32 on the VPU; v5e has no bf16 VPU path).
    h1 = jnp.dot(x, w1_ref[...], preferred_element_type=jnp.float32) + b1_ref[...]
    h1 = jnp.maximum(h1, 0.0)
    # fc2 + ReLU
    h2 = jnp.dot(h1.astype(jnp.bfloat16), w2_ref[...],
                 preferred_element_type=jnp.float32) + b2_ref[...]
    h2 = jnp.maximum(h2, 0.0)
    # fc3 (no activation); output block is unpadded [tile_b, Dout].
    o_ref[...] = (jnp.dot(h2.astype(jnp.bfloat16), w3_ref[...],
                          preferred_element_type=jnp.float32)
                  + b3_ref[...]).astype(o_ref.dtype)


def transition_model_forward(x, params, *, tile_b=4096):
    """x: [B, rnn_hidden_dim + 1] float32.  Returns [B, rnn_hidden_dim] float32."""
    w1, b1, w2, b2, w3, b3 = params
    B, Fin = x.shape
    D1 = w1.shape[1]          # transition_dim
    D2 = w2.shape[1]          # 128
    Dout = w3.shape[1]        # rnn_hidden_dim

    # Pad only the hidden feature dims (weights are tiny and one-time); leave
    # Fin (fc1 K) and Dout (fc3 N) unpadded -> they equal the full array dims,
    # which is a legal block shape, and they carry the dominant HBM traffic.
    D1P = _round_up(D1, 128)
    D2P = _round_up(D2, 128)

    # Batch tile: big to amortize per-step overhead, clamped for tiny batches
    # (multiple of 8 for the sublane constraint), and capped at ~ceil(B/2) so
    # the "parallel" grid axis has >= 2 steps for v7x's two TensorCores.
    tile_b = max(8, min(tile_b, _round_up(B, 8)))
    if B > tile_b:
        tile_b = max(8, min(tile_b, _round_up(pl.cdiv(B, 2), 8)))
    grid = (pl.cdiv(B, tile_b),)   # ragged last block is fine: OOB writes dropped

    bf16 = jnp.bfloat16
    w1p = jnp.zeros((Fin, D1P), bf16).at[:, :D1].set(w1.astype(bf16))
    b1p = jnp.zeros((1, D1P), jnp.float32).at[:, :D1].set(b1.astype(jnp.float32))
    w2p = jnp.zeros((D1P, D2P), bf16).at[:D1, :D2].set(w2.astype(bf16))
    b2p = jnp.zeros((1, D2P), jnp.float32).at[:, :D2].set(b2.astype(jnp.float32))
    w3p = jnp.zeros((D2P, Dout), bf16).at[:D2, :].set(w3.astype(bf16))
    b3p = b3.astype(jnp.float32)

    in_specs = [
        pl.BlockSpec((tile_b, Fin), lambda i: (i, 0)),   # x tile, unpadded f32
        pl.BlockSpec((Fin, D1P), lambda i: (0, 0)),      # w1 (VMEM-resident)
        pl.BlockSpec((1, D1P), lambda i: (0, 0)),        # b1
        pl.BlockSpec((D1P, D2P), lambda i: (0, 0)),      # w2
        pl.BlockSpec((1, D2P), lambda i: (0, 0)),        # b2
        pl.BlockSpec((D2P, Dout), lambda i: (0, 0)),     # w3
        pl.BlockSpec((1, Dout), lambda i: (0, 0)),       # b3
    ]
    out_spec = pl.BlockSpec((tile_b, Dout), lambda i: (i, 0))

    return pl.pallas_call(
        transition_mlp_kernel,
        out_shape=jax.ShapeDtypeStruct((B, Dout), jnp.float32),
        grid=grid,
        in_specs=in_specs,
        out_specs=out_spec,
        compiler_params=pltpu.CompilerParams(
            dimension_semantics=("parallel",)),
    )(x, w1p, b1p, w2p, b2p, w3p, b3p)


def init_params(key, rnn_hidden_dim, transition_dim):
    """Deterministic synthetic init. Weights stored as [in, out] (pre-transposed)."""
    Fin = rnn_hidden_dim + 1
    k = jax.random.split(key, 6)
    w1 = jax.random.normal(k[0], (Fin, transition_dim), jnp.float32) * 0.1
    b1 = jax.random.normal(k[1], (1, transition_dim), jnp.float32) * 0.01
    w2 = jax.random.normal(k[2], (transition_dim, 128), jnp.float32) * 0.1
    b2 = jax.random.normal(k[3], (1, 128), jnp.float32) * 0.01
    w3 = jax.random.normal(k[4], (128, rnn_hidden_dim), jnp.float32) * 0.1
    b3 = jax.random.normal(k[5], (1, rnn_hidden_dim), jnp.float32) * 0.01
    return (w1, b1, w2, b2, w3, b3)


def reference_forward_f32(x, params):
    w1, b1, w2, b2, w3, b3 = params
    h1 = jnp.maximum(x @ w1 + b1, 0.0)
    h2 = jnp.maximum(h1 @ w2 + b2, 0.0)
    return h2 @ w3 + b3


def reference_forward_bf16(x, params):
    """Matches the kernel's numerics: bf16 MXU inputs, f32 accumulate, f32 bias/ReLU."""
    w1, b1, w2, b2, w3, b3 = params
    bf = jnp.bfloat16
    h1 = jnp.maximum(jnp.dot(x.astype(bf), w1.astype(bf),
                             preferred_element_type=jnp.float32) + b1, 0.0)
    h2 = jnp.maximum(jnp.dot(h1.astype(bf), w2.astype(bf),
                             preferred_element_type=jnp.float32) + b2, 0.0)
    return jnp.dot(h2.astype(bf), w3.astype(bf),
                   preferred_element_type=jnp.float32) + b3


if __name__ == "__main__":
    rnn_hidden_dim = 32
    transition_dim = 64

    key = jax.random.PRNGKey(0)
    kx, kp = jax.random.split(key)
    params = init_params(kp, rnn_hidden_dim, transition_dim)

    # Small batch (multiple of 8) and a ragged batch (exercise the cdiv grid /
    # unpadded-batch path).
    for batch in (8, 13):
        x = jax.random.normal(kx, (batch, rnn_hidden_dim + 1), jnp.float32)
        out = transition_model_forward(x, params)
        out = jax.block_until_ready(out)

        ref_bf16 = reference_forward_bf16(x, params)
        ref_f32 = reference_forward_f32(x, params)
        assert out.shape == (batch, rnn_hidden_dim), out.shape
        assert jnp.allclose(out, ref_bf16, atol=1e-2, rtol=1e-2), \
            f"mismatch vs bf16-matched reference (batch={batch})"
        assert jnp.allclose(out, ref_f32, atol=5e-2, rtol=5e-2), \
            f"mismatch vs f32 reference (batch={batch})"

    print("KERNEL_OK")
</pallas_src>

<mosaic_0001>
module attributes {stable_mosaic.version = 11 : i64} {
  func.func @transition_mlp_kernel(%arg0: i32, %arg1: memref<8x33xf32, #tpu.memory_space<vmem>>, %arg2: memref<33x128xbf16, #tpu.memory_space<vmem>>, %arg3: memref<1x128xf32, #tpu.memory_space<vmem>>, %arg4: memref<128x128xbf16, #tpu.memory_space<vmem>>, %arg5: memref<1x128xf32, #tpu.memory_space<vmem>>, %arg6: memref<128x32xbf16, #tpu.memory_space<vmem>>, %arg7: memref<1x32xf32, #tpu.memory_space<vmem>>, %arg8: memref<8x32xf32, #tpu.memory_space<vmem>>) attributes {dimension_semantics = [#tpu.dimension_semantics<parallel>], iteration_bounds = array<i64: 1>, scalar_prefetch = 0 : i64, scratch_operands = 0 : i64, tpu.core_type = #tpu.core_type<tc>, window_params = [{transform_indices = @transform_0, window_bounds = array<i64: 8, 33>}, {pipeline_mode = #tpu.pipeline_mode<synchronous>, transform_indices = @transform_1, window_bounds = array<i64: 33, 128>}, {pipeline_mode = #tpu.pipeline_mode<synchronous>, transform_indices = @transform_2, window_bounds = array<i64: 1, 128>}, {pipeline_mode = #tpu.pipeline_mode<synchronous>, transform_indices = @transform_3, window_bounds = array<i64: 128, 128>}, {pipeline_mode = #tpu.pipeline_mode<synchronous>, transform_indices = @transform_4, window_bounds = array<i64: 1, 128>}, {pipeline_mode = #tpu.pipeline_mode<synchronous>, transform_indices = @transform_5, window_bounds = array<i64: 128, 32>}, {pipeline_mode = #tpu.pipeline_mode<synchronous>, transform_indices = @transform_6, window_bounds = array<i64: 1, 32>}, {transform_indices = @transform_7, window_bounds = array<i64: 8, 32>}]} {
    %c0 = arith.constant 0 : index
    %c0_0 = arith.constant 0 : index
    %0 = vector.load %arg1[%c0, %c0_0] : memref<8x33xf32, #tpu.memory_space<vmem>>, vector<8x33xf32>
    %1 = arith.truncf %0 : vector<8x33xf32> to vector<8x33xbf16>
    %c0_1 = arith.constant 0 : index
    %c0_2 = arith.constant 0 : index
    %2 = vector.load %arg2[%c0_1, %c0_2] : memref<33x128xbf16, #tpu.memory_space<vmem>>, vector<33x128xbf16>
    %cst = arith.constant dense<0.000000e+00> : vector<8x128xf32>
    %3 = tpu.matmul %1, %2, %cst {dimension_numbers = #tpu.dot_dimension_numbers<[1], [0], [0], [1], [0, 0, 1, 1], [], []>} : vector<8x33xbf16>, vector<33x128xbf16>, vector<8x128xf32> -> vector<8x128xf32>
    %c0_3 = arith.constant 0 : index
    %c0_4 = arith.constant 0 : index
    %4 = vector.load %arg3[%c0_3, %c0_4] : memref<1x128xf32, #tpu.memory_space<vmem>>, vector<1x128xf32>
    %5 = vector.broadcast %4 : vector<1x128xf32> to vector<8x128xf32>
    %6 = arith.addf %3, %5 : vector<8x128xf32>
    %cst_5 = arith.constant 0.000000e+00 : f32
    %7 = vector.broadcast %cst_5 : f32 to vector<8x128xf32>
    %8 = arith.maximumf %6, %7 : vector<8x128xf32>
    %9 = arith.truncf %8 : vector<8x128xf32> to vector<8x128xbf16>
    %c0_6 = arith.constant 0 : index
    %c0_7 = arith.constant 0 : index
    %10 = vector.load %arg4[%c0_6, %c0_7] : memref<128x128xbf16, #tpu.memory_space<vmem>>, vector<128x128xbf16>
    %cst_8 = arith.constant dense<0.000000e+00> : vector<8x128xf32>
    %11 = tpu.matmul %9, %10, %cst_8 {dimension_numbers = #tpu.dot_dimension_numbers<[1], [0], [0], [1], [0, 0, 1, 1], [], []>} : vector<8x128xbf16>, vector<128x128xbf16>, vector<8x128xf32> -> vector<8x128xf32>
    %c0_9 = arith.constant 0 : index
    %c0_10 = arith.constant 0 : index
    %12 = vector.load %arg5[%c0_9, %c0_10] : memref<1x128xf32, #tpu.memory_space<vmem>>, vector<1x128xf32>
    %13 = vector.broadcast %12 : vector<1x128xf32> to vector<8x128xf32>
    %14 = arith.addf %11, %13 : vector<8x128xf32>
    %cst_11 = arith.constant 0.000000e+00 : f32
    %15 = vector.broadcast %cst_11 : f32 to vector<8x128xf32>
    %16 = arith.maximumf %14, %15 : vector<8x128xf32>
    %17 = arith.truncf %16 : vector<8x128xf32> to vector<8x128xbf16>
    %c0_12 = arith.constant 0 : index
    %c0_13 = arith.constant 0 : index
    %18 = vector.load %arg6[%c0_12, %c0_13] : memref<128x32xbf16, #tpu.memory_space<vmem>>, vector<128x32xbf16>
    %cst_14 = arith.constant dense<0.000000e+00> : vector<8x32xf32>
    %19 = tpu.matmul %17, %18, %cst_14 {dimension_numbers = #tpu.dot_dimension_numbers<[1], [0], [0], [1], [0, 0, 1, 1], [], []>} : vector<8x128xbf16>, vector<128x32xbf16>, vector<8x32xf32> -> vector<8x32xf32>
    %c0_15 = arith.constant 0 : index
    %c0_16 = arith.constant 0 : index
    %20 = vector.load %arg7[%c0_15, %c0_16] : memref<1x32xf32, #tpu.memory_space<vmem>>, vector<1x32xf32>
    %21 = vector.broadcast %20 : vector<1x32xf32> to vector<8x32xf32>
    %22 = arith.addf %19, %21 : vector<8x32xf32>
    %c0_17 = arith.constant 0 : index
    %c0_18 = arith.constant 0 : index
    %23 = vector.load %arg8[%c0_17, %c0_18] : memref<8x32xf32, #tpu.memory_space<vmem>>, vector<8x32xf32>
    tpu.vector_store %arg8[%c0_17, %c0_18], %22 {strides = array<i32>} : memref<8x32xf32, #tpu.memory_space<vmem>>, vector<8x32xf32>,
    return
  }
  func.func @transform_0(%arg0: i32) -> (i32, i32) {
    %c0_i32 = arith.constant 0 : i32
    %c0_i32_0 = arith.constant 0 : i32
    return %arg0, %c0_i32 : i32, i32
  }
  func.func @transform_1(%arg0: i32) -> (i32, i32) {
    %c0_i32 = arith.constant 0 : i32
    %c0_i32_0 = arith.constant 0 : i32
    %c0_i32_1 = arith.constant 0 : i32
    return %c0_i32, %c0_i32_0 : i32, i32
  }
  func.func @transform_2(%arg0: i32) -> (i32, i32) {
    %c0_i32 = arith.constant 0 : i32
    %c0_i32_0 = arith.constant 0 : i32
    %c0_i32_1 = arith.constant 0 : i32
    return %c0_i32, %c0_i32_0 : i32, i32
  }
  func.func @transform_3(%arg0: i32) -> (i32, i32) {
    %c0_i32 = arith.constant 0 : i32
    %c0_i32_0 = arith.constant 0 : i32
    %c0_i32_1 = arith.constant 0 : i32
    return %c0_i32, %c0_i32_0 : i32, i32
  }
  func.func @transform_4(%arg0: i32) -> (i32, i32) {
    %c0_i32 = arith.constant 0 : i32
    %c0_i32_0 = arith.constant 0 : i32
    %c0_i32_1 = arith.constant 0 : i32
    return %c0_i32, %c0_i32_0 : i32, i32
  }
  func.func @transform_5(%arg0: i32) -> (i32, i32) {
    %c0_i32 = arith.constant 0 : i32
    %c0_i32_0 = arith.constant 0 : i32
    %c0_i32_1 = arith.constant 0 : i32
    return %c0_i32, %c0_i32_0 : i32, i32
  }
  func.func @transform_6(%arg0: i32) -> (i32, i32) {
    %c0_i32 = arith.constant 0 : i32
    %c0_i32_0 = arith.constant 0 : i32
    %c0_i32_1 = arith.constant 0 : i32
    return %c0_i32, %c0_i32_0 : i32, i32
  }
  func.func @transform_7(%arg0: i32) -> (i32, i32) {
    %c0_i32 = arith.constant 0 : i32
    %c0_i32_0 = arith.constant 0 : i32
    return %arg0, %c0_i32 : i32, i32
  }
}

</mosaic_0001>

<bundles_post_ra>
// kernel: tpu_custom_call.1
= control target key start
LH: loop header
LB: loop body
LE: loop exit
PB: predicated region body
PF: predicated region fallthrough
CT: control target
= control target key end

     0   :  { %12 = vsyncpa [#allocation3], 0  ;;  %s689_s0 = inlined_call_operand.hbm [shape: f32[8,33], index: 0, kind: input, shape index: {}]   ;;  %s690_s1 = inlined_call_operand.vmem [shape: bf16[33,128], index: 1, kind: input, shape index: {}]   ;;  %s691_s2 = inlined_call_operand.vmem [shape: f32[1,128], index: 2, kind: input, shape index: {}]   ;;  %s692_s3 = inlined_call_operand.vmem [shape: bf16[128,128], index: 3, kind: input, shape index: {}]   ;;  %s693_s4 = inlined_call_operand.vmem [shape: f32[1,128], index: 4, kind: input, shape index: {}]   ;;  %s694_s5 = inlined_call_operand.vmem [shape: bf16[128,32], index: 5, kind: input, shape index: {}]   ;;  %s695_s6 = inlined_call_operand.vmem [shape: f32[1,32], index: 6, kind: input, shape index: {}]   ;;  %s696_s7 = inlined_call_operand.hbm [shape: f32[8,32], index: 7, kind: output, shape index: {}]  }
   0x1   :  { %13 = vsyncpa [#allocation4], 0  ;;  %s529_s24 = smov [#allocation2]   ;;  %s481_s28 = scalar_lea.hbm %s689_s0, 128 }
   0x2   :  { %s20_s25 = sshll.u32 %s529_s24, 4  ;;  %p482_p0 = scmp.ne.s32.totalorder %s689_s0, %s481_s28  ;;  %s21_s25 = int_to_ptr.vmem [resolvable:$true] %s20_s25 }
   0x3   :  { %p485_p1 = scmp.lt.u32.totalorder %s481_s28, %s689_s0 }
   0x5   :  { %p487_p2 = pnand %p485_p1, %p482_p0 }
   0x7   :  { %490 = shalt.err (!%p487_p2)
}
   0x8   :  { %s491_s10 = scalar_lea.vmem %s21_s25, 128  ;;  %p496_p4 = scmp.lt.s32.totalorder %s21_s25, %s21_s25 }
   0x9   :  { %p492_p3 = scmp.ne.s32.totalorder %s21_s25, %s491_s10  ;;  %p497_p5 = scmp.lt.s32.totalorder %s491_s10, %s491_s10 }
   0xb   :  { %p498_p6 = por %p497_p5, %p496_p4 }
   0xd   :  { %p499_p7 = pnand %p498_p6, %p492_p3 }
   0xf   :  { %502 = shalt.err (!%p499_p7)
}
  0x10   :  { %23 = dma.hbm_to_vmem [thread:$0]  %s689_s0, 128, %s21_s25, [#allocation3]  }
  0x11   :  { %525 = dma.done.wait [#allocation3], 128  }
  0x12   :  { %526 = vsyncadd [#allocation3], 4294967168  ;;  %v530_v0 = vmov 0.0   ;;  %vm531_vm0 = vmmov 0   ;;  %vm73_vm1 = vcmask 1040384   ;;  %v462_v1 = vld [vmem:[%s690_s1] sm:$0xff]  }
  0x13   :  { %407 = vmatprep.subr.bf16.mxu0 %v530_v0  ;;  %413 = vmatprep.mubr.msk.bf16.mxu0 %vm531_vm0, %v530_v0  ;;  %v463_v2 = vld [vmem:[%s690_s1 + $0x8] sm:$0xff]   ;;  %v464_v3 = vld [vmem:[%s690_s1 + $0x10] ss:$0 sps:$4 sm:$0x11]   ;;  %v532_v4 = vmov 0   ;;  %v465_v6 = vld [vmem:[%s692_s3] sm:$0xff]  }
  0x14   :  { %417 = vmatprep.subr.bf16.mxu1 %v530_v0  ;;  %433 = vmatprep.mubr.msk.bf16.mxu1 %vm531_vm0, %v530_v0  ;;  %v75_v5 = vsel %vm73_vm1, 65535, %v532_v4  ;;  %v466_v7 = vld [vmem:[%s692_s3 + $0x8] sm:$0xff]   ;;  %v40_v9 = vld [vmem:[#allocation2] sm:$0xff]  ;;  %vm69_vm2 = vcmask 269312   ;;  %v467_v11 = vld [vmem:[%s692_s3 + $0x10] sm:$0xff]   ;;  %s533_s28 = smov [#allocation5]  }
  0x15   :  { %408 = vmatpush3.bf16.msra.mxu0 %v462_v1  ;;  %418 = vmatpush3.bf16.msra.mxu1 %v465_v6  ;;  %v77_v8 = vand.u32 %v464_v3, %v75_v5  ;;  %v41_v10 = vpack.c.bf16 %v40_v9, %v40_v9  ;;  %v468_v12 = vld [vmem:[%s692_s3 + $0x18] sm:$0xff]   ;;  %v469_v13 = vld [vmem:[%s692_s3 + $0x20] sm:$0xff]   ;;  %v470_v14 = vld [vmem:[%s692_s3 + $0x28] sm:$0xff]   ;;  %s353_s29 = sshll.u32 %s533_s28, 4  ;;  %vm345_vm3 = vcmask 261120   ;;  %s354_s29 = int_to_ptr.vmem [resolvable:$true] %s353_s29 }
  0x16   :  { %409 = vmatprep.subr.bf16.mxu0 %v530_v0  ;;  %419 = vmatprep.subr.bf16.mxu1 %v530_v0  ;;  %v471_v15 = vld [vmem:[%s692_s3 + $0x30] sm:$0xff]   ;;  %v472_v16 = vld [vmem:[%s692_s3 + $0x38] sm:$0xff]   ;;  %v473_v17 = vld [vmem:[%s694_s5] sm:$0xff]   ;;  %p508_p9 = scmp.lt.s32.totalorder %s354_s29, %s354_s29 }
  0x17   :  { %v474_v18 = vld [vmem:[%s694_s5 + $0x8] sm:$0xff]   ;;  %v475_v19 = vld [vmem:[%s694_s5 + $0x10] sm:$0xff]   ;;  %v476_v20 = vld [vmem:[%s694_s5 + $0x18] sm:$0xff]  }
  0x18   :  { %v477_v21 = vld [vmem:[%s694_s5 + $0x20] sm:$0xff]   ;;  %v478_v22 = vld [vmem:[%s694_s5 + $0x28] sm:$0xff]   ;;  %v479_v31 = vld [vmem:[%s694_s5 + $0x30] sm:$0xff]  }
  0x19   :  { %410 = vmatpush3.bf16.msra.mxu0 %v463_v2  ;;  %420 = vmatpush3.bf16.msra.mxu1 %v466_v7  ;;  %v362_v23 = vld [vmem:[%s691_s2] ss:$0 sm:$0xff]  ;;  %v480_v32 = vld [vmem:[%s694_s5 + $0x38] sm:$0xff]  }
  0x1a   :  { %411 = vmatprep.subr.bf16.mxu0 %v530_v0  ;;  %421 = vmatprep.subr.bf16.mxu1 %v530_v0  ;;  %v367_v33 = vld [vmem:[%s693_s4] ss:$0 sm:$0xff]  ;;  %s503_s4 = scalar_lea.vmem %s354_s29, 128 }
  0x1b   :  { %v376_v41 = vld [vmem:[%s695_s6] ss:$0 sm:$0xff]  ;;  %p504_p8 = scmp.ne.s32.totalorder %s354_s29, %s503_s4  ;;  %p509_p10 = scmp.lt.s32.totalorder %s503_s4, %s503_s4 }
  0x1d   :  { %412 = vmatpush3.bf16.msra.mxu0 %v77_v8  ;;  %422 = vmatpush3.bf16.msra.mxu1 %v467_v11  ;;  %p510_p11 = por %p509_p10, %p508_p9 }
  0x1e   :  { %437 = vmatprep.subr.bf16.mxu0 %v530_v0  ;;  %423 = vmatprep.subr.bf16.mxu1 %v530_v0 }
  0x1f   :  { %p511_p12 = pnand %p510_p11, %p504_p8 }
  0x20   :  { %414 = vmatmul.mubr.msk.bf16.vlgmr.msra.gmra.mrb[0].mxu0 %vm69_vm2, %v41_v10 }
  0x21   :  { %453 = vmatprep.mubr.msk.bf16.mxu0 %vm531_vm0, %v530_v0  ;;  %424 = vmatpush3.bf16.msra.mxu1 %v468_v12 }
  0x22   :  { %425 = vmatprep.subr.bf16.mxu1 %v530_v0  ;;  %438 = vmatpush3.bf16.msra.mxu0 %v473_v17 }
  0x23   :  { %439 = vmatprep.subr.bf16.mxu0 %v530_v0 }
  0x25   :  { %426 = vmatpush3.bf16.msra.mxu1 %v469_v13 }
  0x26   :  { %427 = vmatprep.subr.bf16.mxu1 %v530_v0  ;;  %440 = vmatpush3.bf16.msra.mxu0 %v474_v18 }
  0x27   :  { %441 = vmatprep.subr.bf16.mxu0 %v530_v0 }
  0x29   :  { %428 = vmatpush3.bf16.msra.mxu1 %v470_v14 }
  0x2a   :  { %429 = vmatprep.subr.bf16.mxu1 %v530_v0  ;;  %442 = vmatpush3.bf16.msra.mxu0 %v475_v19 }
  0x2b   :  { %443 = vmatprep.subr.bf16.mxu0 %v530_v0 }
  0x2d   :  { %430 = vmatpush3.bf16.msra.mxu1 %v471_v15 }
  0x2e   :  { %431 = vmatprep.subr.bf16.mxu1 %v530_v0  ;;  %444 = vmatpush3.bf16.msra.mxu0 %v476_v20 }
  0x2f   :  { %445 = vmatprep.subr.bf16.mxu0 %v530_v0 }
  0x31   :  { %432 = vmatpush3.bf16.msra.mxu1 %v472_v16 }
  0x32   :  { %446 = vmatpush3.bf16.msra.mxu0 %v477_v21 }
  0x33   :  { %447 = vmatprep.subr.bf16.mxu0 %v530_v0 }
  0x36   :  { %448 = vmatpush3.bf16.msra.mxu0 %v478_v22 }
  0x37   :  { %449 = vmatprep.subr.bf16.mxu0 %v530_v0 }
  0x3a   :  { %450 = vmatpush3.bf16.msra.mxu0 %v479_v31 }
  0x3b   :  { %451 = vmatprep.subr.bf16.mxu0 %v530_v0 }
  0x3e   :  { %452 = vmatpush3.bf16.msra.mxu0 %v480_v32 }
  0xf3   :  { %v113_v24 = vpop.f32.mrb[0].mxu0 }
  0xf4   :  { %v114_v25 = vadd.f32 %v362_v23, %v113_v24  ;;  %v415_v26 = vpop.f32.mrb[1].mxu0 }
  0xf5   :  { %v116_v27 = vpop.f32.mrb[2].mxu0 }
  0xf6   :  { %v119_v28 = vmax.f32 %v114_v25, 0.0  ;;  %v416_v29 = vpop.f32.mrb[3].mxu0 }
  0xf8   :  { %v120_v30 = vpack.c.bf16 %v119_v28, %v119_v28 }
  0xfa   :  { %434 = vmatmul.mubr.bf16.vlgmr.msra.gmra.mrb[0].mxu1 %v120_v30 }
 0x1cd   :  { %v226_v34 = vpop.f32.mrb[0].mxu1 }
 0x1ce   :  { %v227_v35 = vadd.f32 %v367_v33, %v226_v34  ;;  %v435_v36 = vpop.f32.mrb[1].mxu1 }
 0x1cf   :  { %v229_v37 = vpop.f32.mrb[2].mxu1 }
 0x1d0   :  { %v232_v38 = vmax.f32 %v227_v35, 0.0  ;;  %v436_v39 = vpop.f32.mrb[3].mxu1 }
 0x1d2   :  { %v233_v40 = vpack.c.bf16 %v232_v38, %v232_v38 }
 0x1d4   :  { %454 = vmatmul.mubr.bf16.vlgmr.msra.gmra.mrb[4].mxu0 %v233_v40 }
 0x2a7   :  { %v339_v42 = vpop.f32.mrb[4].mxu0 }
 0x2a8   :  { %v340_v43 = vadd.f32 %v376_v41, %v339_v42  ;;  %v455_v44 = vpop.f32.mrb[5].mxu0 }
 0x2a9   :  { %v342_v45 = vpop.f32.mrb[6].mxu0 }
 0x2aa   :  { %v456_v46 = vpop.f32.mrb[7].mxu0  ;;  %346 = vst.msk [vmem:[#allocation5] sm:$0xff] %vm345_vm3, %v340_v43 }
 0x2ab   :  { %514 = shalt.err (!%p511_p12)
}
 0x2ac   :  { %s515_s6 = scalar_lea.hbm %s696_s7, 128 }
 0x2ad   :  { %p516_p13 = scmp.ne.s32.totalorder %s696_s7, %s515_s6  ;;  %p519_p0 = scmp.lt.u32.totalorder %s515_s6, %s696_s7 }
 0x2af   :  { %p521_p1 = pnand %p519_p0, %p516_p13 }
 0x2b1   :  { %524 = shalt.err (!%p521_p1)
}
 0x2b2   :  { %356 = dma.vmem_to_hbm [thread:$0]  %s354_s29, 128, %s696_s7, [#allocation4]  }
 0x2b3   :  { %527 = dma.done.wait [#allocation4], 128  }
 0x2b4   :  { %528 = vsyncadd [#allocation4], 4294967168 }
 0x2b5   :  { %360 = vsyncpa [#allocation3], 1 }
 0x2b6   :  { %361 = vsyncpa [#allocation4], 1 }

</bundles_post_ra>
